<compile_context>
chip_gen: v7x
topology: tpu7x:2x2x1
jax: 0.10.0
libtpu: 0.0.40
codegen_flags: <defaults>
</compile_context>

<pallas_src>
from functools import partial

import jax
import jax.numpy as jnp
from jax.experimental import pallas as pl
from jax.experimental.pallas import tpu as pltpu

EPS = 1e-5        # nn.BatchNorm2d default eps
SUBLANE = 8       # Cout is padded to this (f32 sublane width), not to 128 lanes


# ---------------- Pallas kernels ----------------

def _make_stats_kernel(total_rows, tile_r):
    """Pass 1: conv-as-matmul per tile -> per-tile (mean, M2) BN partials."""
    def kernel(p_ref, w_ref, mean_ref, m2_ref):
        i = pl.program_id(0)
        # (Cout_pad, KK) @ (KK, tile_r) on the MXU, bf16 operands / f32 accum.
        acc = jnp.dot(w_ref[...], p_ref[...], preferred_element_type=jnp.float32)
        # Mask columns past the true row count (ragged last tile reads garbage).
        rem = total_rows - i * tile_r
        col = jax.lax.broadcasted_iota(jnp.int32, acc.shape, 1)
        valid = col < rem
        cnt = jnp.minimum(rem, tile_r).astype(jnp.float32)
        mean = jnp.sum(jnp.where(valid, acc, 0.0), axis=1, keepdims=True) / cnt
        diff = jnp.where(valid, acc - mean, 0.0)
        m2 = jnp.sum(diff * diff, axis=1, keepdims=True)
        mean_ref[...] = mean[None]                 # (1, Cout_pad, 1)
        m2_ref[...] = m2[None]
    return kernel


def _conv_bn_relu_kernel(p_ref, w_ref, scale_ref, shift_ref, o_ref):
    """Pass 2: recompute the conv tile, apply folded BN affine + ReLU."""
    acc = jnp.dot(w_ref[...], p_ref[...], preferred_element_type=jnp.float32)
    y = acc * scale_ref[...] + shift_ref[...]      # (Cout_pad,1) lane-broadcast
    o_ref[...] = jnp.maximum(y, 0.0)


# ---------------- wrapper ----------------

def conv2d_block_forward(x, w, gamma, beta, *, kernel_size=3, dilation=1,
                         tile_r=8192):
    """x: (N, Cin, H, W) NCHW; w: (Cout, Cin, K, K) OIHW (PyTorch layouts)."""
    N, Cin, H, W = x.shape
    Cout = w.shape[0]
    K = kernel_size
    KK = Cin * K * K
    pad = (1 + dilation * (K - 1)) // 2          # padding='same' rule
    R = N * H * W
    Cp = -(-Cout // SUBLANE) * SUBLANE           # pad Cout to the sublane width

    assert tile_r % 128 == 0, "tile_r must be a multiple of the 128-lane width"
    tile_r = min(tile_r, -(-R // 128) * 128)     # don't exceed (rounded-up) R
    n_tiles = pl.cdiv(R, tile_r)

    # --- ReflectionPad2d + im2col, built ONCE in bf16 directly in (KK, R)
    #     order (ci-major, then ki, kj rows; (n,h,w) columns). ---
    x_cn = jnp.transpose(x, (1, 0, 2, 3)).astype(jnp.bfloat16)     # (Cin,N,H,W)
    xp = jnp.pad(x_cn, ((0, 0), (0, 0), (pad, pad), (pad, pad)), mode="reflect")
    cols = []
    for ki in range(K):
        for kj in range(K):
            di, dj = ki * dilation, kj * dilation
            cols.append(xp[:, :, di:di + H, dj:dj + W])            # (Cin,N,H,W)
    patches = jnp.stack(cols, axis=1).reshape(KK, R)               # (KK,R) bf16

    # (Cout, Cin*K*K) -> (Cout_pad, KK) bf16; row order matches patches' KK
    # order, i.e. PyTorch's OIHW flatten.
    w_mat = (jnp.zeros((Cp, KK), jnp.float32)
             .at[:Cout].set(w.reshape(Cout, KK).astype(jnp.float32))
             .astype(jnp.bfloat16))

    # VMEM footprint per step (patches + out blocks, double-buffered) is ~2 MiB
    # at tile_r=8192, so the default scoped VMEM limit is fine on v5e/v6e/v7x.
    cparams = pltpu.CompilerParams(dimension_semantics=("parallel",))

    # ---- pass 1: per-tile conv matmul -> per-tile (mean, M2) partials ----
    mean_parts, m2_parts = pl.pallas_call(
        _make_stats_kernel(R, tile_r),
        out_shape=(
            jax.ShapeDtypeStruct((n_tiles, Cp, 1), jnp.float32),
            jax.ShapeDtypeStruct((n_tiles, Cp, 1), jnp.float32),
        ),
        grid=(n_tiles,),
        in_specs=[
            pl.BlockSpec((KK, tile_r), lambda i: (0, i)),
            pl.BlockSpec((Cp, KK), lambda i: (0, 0)),
        ],
        out_specs=(
            pl.BlockSpec((1, Cp, 1), lambda i: (i, 0, 0)),
            pl.BlockSpec((1, Cp, 1), lambda i: (i, 0, 0)),
        ),
        compiler_params=cparams,
    )(patches, w_mat)

    # ---- tiny finalize (plain JAX): Chan's parallel-variance combine, fold
    #      mean / inv_std with gamma / beta into per-channel scale & shift. ----
    counts = jnp.clip(
        jnp.float32(R) - jnp.arange(n_tiles, dtype=jnp.float32) * tile_r,
        0.0, float(tile_r))                                        # (n_tiles,)
    means = mean_parts[:, :, 0]                                    # (n_tiles,Cp)
    m2s = m2_parts[:, :, 0]
    total = jnp.float32(R)
    mean = jnp.sum(means * (counts[:, None] / total), axis=0)      # (Cp,)
    m2 = (jnp.sum(m2s, axis=0)
          + jnp.sum(counts[:, None] * jnp.square(means - mean[None, :]), axis=0))
    var = jnp.maximum(m2 / total, 0.0)      # biased batch variance (train mode)
    inv = jax.lax.rsqrt(var + EPS)
    gamma_p = jnp.zeros((Cp,), jnp.float32).at[:Cout].set(gamma.astype(jnp.float32))
    beta_p = jnp.zeros((Cp,), jnp.float32).at[:Cout].set(beta.astype(jnp.float32))
    scale = (gamma_p * inv).reshape(Cp, 1)
    shift = (beta_p - mean * gamma_p * inv).reshape(Cp, 1)

    # ---- pass 2: recompute conv tile, apply folded BN + ReLU (lane-dense) ----
    out_cr = pl.pallas_call(
        _conv_bn_relu_kernel,
        out_shape=jax.ShapeDtypeStruct((Cp, R), jnp.float32),
        grid=(n_tiles,),
        in_specs=[
            pl.BlockSpec((KK, tile_r), lambda i: (0, i)),
            pl.BlockSpec((Cp, KK), lambda i: (0, 0)),
            pl.BlockSpec((Cp, 1), lambda i: (0, 0)),
            pl.BlockSpec((Cp, 1), lambda i: (0, 0)),
        ],
        out_specs=pl.BlockSpec((Cp, tile_r), lambda i: (0, i)),
        compiler_params=cparams,
    )(patches, w_mat, scale, shift)

    # (Cout_pad, N*H*W) -> NCHW to match the PyTorch module's output layout.
    out = out_cr[:Cout].reshape(Cout, N, H, W)
    return jnp.transpose(out, (1, 0, 2, 3))


# ---------------- pure-JAX reference ----------------

def reference_forward(x, w, gamma, beta, *, kernel_size=3, dilation=1):
    """Reflection pad + conv + batch-stat BN + ReLU, all f32."""
    K = kernel_size
    pad = (1 + dilation * (K - 1)) // 2
    xp = jnp.pad(x, ((0, 0), (0, 0), (pad, pad), (pad, pad)), mode="reflect")
    y = jax.lax.conv_general_dilated(
        xp.astype(jnp.float32), w.astype(jnp.float32),
        window_strides=(1, 1), padding="VALID",
        rhs_dilation=(dilation, dilation),
        dimension_numbers=("NCHW", "OIHW", "NCHW"))
    mean = y.mean(axis=(0, 2, 3), keepdims=True)
    var = jnp.square(y - mean).mean(axis=(0, 2, 3), keepdims=True)
    yn = (y - mean) * jax.lax.rsqrt(var + EPS)
    yn = yn * gamma.reshape(1, -1, 1, 1) + beta.reshape(1, -1, 1, 1)
    return jnp.maximum(yn, 0.0)


if __name__ == "__main__":
    # Small shapes consistent with the module: Conv2dBlock(4, 8, kernel_size=3)
    N, Cin, H, W = 2, 4, 16, 16
    Cout, K = 8, 3

    key = jax.random.PRNGKey(0)
    kx, kw = jax.random.split(key)
    x = jax.random.normal(kx, (N, Cin, H, W), dtype=jnp.float32)
    w = 0.1 * jax.random.normal(kw, (Cout, Cin, K, K), dtype=jnp.float32)
    # BatchNorm2d affine params at their PyTorch initialization.
    gamma = jnp.ones((Cout,), dtype=jnp.float32)
    beta = jnp.zeros((Cout,), dtype=jnp.float32)

    ref = reference_forward(x, w, gamma, beta, kernel_size=K)

    # Config A: tile_r=128 -> 4 even tiles (multi-tile stats combine, and the
    # "parallel" axis has enough tiles for both v7x TensorCores).
    fwd_a = jax.jit(partial(conv2d_block_forward, kernel_size=K, tile_r=128))
    out_a = jax.block_until_ready(fwd_a(x, w, gamma, beta))
    assert out_a.shape == (N, Cout, H, W), out_a.shape
    err_a = float(jnp.max(jnp.abs(out_a - ref)))
    # bf16 MXU operands (f32 accumulation) -> tolerance loosened vs pure-f32.
    assert jnp.allclose(out_a, ref, atol=2e-2, rtol=2e-2), err_a

    # Config B: tile_r=384 -> ragged last tile (exercises in-kernel masking).
    fwd_b = jax.jit(partial(conv2d_block_forward, kernel_size=K, tile_r=384))
    out_b = jax.block_until_ready(fwd_b(x, w, gamma, beta))
    err_b = float(jnp.max(jnp.abs(out_b - ref)))
    assert jnp.allclose(out_b, ref, atol=2e-2, rtol=2e-2), err_b

    print("KERNEL_OK")
</pallas_src>

<mosaic_0001>
module attributes {stable_mosaic.version = 11 : i64} {
  func.func @kernel(%arg0: i32, %arg1: memref<36x128xbf16, #tpu.memory_space<vmem>>, %arg2: memref<8x36xbf16, #tpu.memory_space<vmem>>, %arg3: memref<1x8x1xf32, #tpu.memory_space<vmem>>, %arg4: memref<1x8x1xf32, #tpu.memory_space<vmem>>) attributes {dimension_semantics = [#tpu.dimension_semantics<parallel>], iteration_bounds = array<i64: 4>, scalar_prefetch = 0 : i64, scratch_operands = 0 : i64, tpu.core_type = #tpu.core_type<tc>, window_params = [{transform_indices = @transform_0, window_bounds = array<i64: 36, 128>}, {pipeline_mode = #tpu.pipeline_mode<synchronous>, transform_indices = @transform_1, window_bounds = array<i64: 8, 36>}, {transform_indices = @transform_2, window_bounds = array<i64: 1, 8, 1>}, {transform_indices = @transform_3, window_bounds = array<i64: 1, 8, 1>}]} {
    %c0 = arith.constant 0 : index
    %c0_0 = arith.constant 0 : index
    %0 = vector.load %arg2[%c0, %c0_0] : memref<8x36xbf16, #tpu.memory_space<vmem>>, vector<8x36xbf16>
    %c0_1 = arith.constant 0 : index
    %c0_2 = arith.constant 0 : index
    %1 = vector.load %arg1[%c0_1, %c0_2] : memref<36x128xbf16, #tpu.memory_space<vmem>>, vector<36x128xbf16>
    %cst = arith.constant dense<0.000000e+00> : vector<8x128xf32>
    %2 = tpu.matmul %0, %1, %cst {dimension_numbers = #tpu.dot_dimension_numbers<[1], [0], [0], [1], [0, 0, 1, 1], [], []>} : vector<8x36xbf16>, vector<36x128xbf16>, vector<8x128xf32> -> vector<8x128xf32>
    %c128_i32 = arith.constant 128 : i32
    %3 = arith.muli %arg0, %c128_i32 : i32
    %c512_i32 = arith.constant 512 : i32
    %4 = arith.subi %c512_i32, %3 : i32
    %5 = tpu.iota {dimensions = array<i32: 1>} : vector<8x128xi32>
    %6 = vector.broadcast %4 : i32 to vector<8x128xi32>
    %7 = arith.cmpi slt, %5, %6 : vector<8x128xi32>
    %c128_i32_3 = arith.constant 128 : i32
    %8 = arith.minsi %4, %c128_i32_3 : i32
    %9 = arith.sitofp %8 : i32 to f32
    %cst_4 = arith.constant 0.000000e+00 : f32
    %10 = vector.broadcast %cst_4 : f32 to vector<8x128xf32>
    %11 = arith.select %7, %2, %10 : vector<8x128xi1>, vector<8x128xf32>
    %cst_5 = arith.constant dense<0.000000e+00> : vector<8xf32>
    %12 = vector.multi_reduction <add>, %11, %cst_5 [1] : vector<8x128xf32> to vector<8xf32>
    %13 = vector.shape_cast %12 : vector<8xf32> to vector<8x1xf32>
    %14 = vector.broadcast %9 : f32 to vector<8x1xf32>
    %15 = arith.divf %13, %14 : vector<8x1xf32>
    %16 = vector.broadcast %15 : vector<8x1xf32> to vector<8x128xf32>
    %17 = arith.subf %2, %16 : vector<8x128xf32>
    %cst_6 = arith.constant 0.000000e+00 : f32
    %18 = vector.broadcast %cst_6 : f32 to vector<8x128xf32>
    %19 = arith.select %7, %17, %18 : vector<8x128xi1>, vector<8x128xf32>
    %20 = arith.mulf %19, %19 : vector<8x128xf32>
    %cst_7 = arith.constant dense<0.000000e+00> : vector<8xf32>
    %21 = vector.multi_reduction <add>, %20, %cst_7 [1] : vector<8x128xf32> to vector<8xf32>
    %22 = vector.shape_cast %21 : vector<8xf32> to vector<8x1xf32>
    %23 = vector.shape_cast %15 : vector<8x1xf32> to vector<1x8x1xf32>
    %c0_8 = arith.constant 0 : index
    %c0_9 = arith.constant 0 : index
    %c0_10 = arith.constant 0 : index
    %24 = vector.load %arg3[%c0_8, %c0_9, %c0_10] : memref<1x8x1xf32, #tpu.memory_space<vmem>>, vector<1x8x1xf32>
    tpu.vector_store %arg3[%c0_8, %c0_9, %c0_10], %23 {strides = array<i32>} : memref<1x8x1xf32, #tpu.memory_space<vmem>>, vector<1x8x1xf32>,
    %25 = vector.shape_cast %22 : vector<8x1xf32> to vector<1x8x1xf32>
    %c0_11 = arith.constant 0 : index
    %c0_12 = arith.constant 0 : index
    %c0_13 = arith.constant 0 : index
    %26 = vector.load %arg4[%c0_11, %c0_12, %c0_13] : memref<1x8x1xf32, #tpu.memory_space<vmem>>, vector<1x8x1xf32>
    tpu.vector_store %arg4[%c0_11, %c0_12, %c0_13], %25 {strides = array<i32>} : memref<1x8x1xf32, #tpu.memory_space<vmem>>, vector<1x8x1xf32>,
    return
  }
  func.func @transform_0(%arg0: i32) -> (i32, i32) {
    %c0_i32 = arith.constant 0 : i32
    %c0_i32_0 = arith.constant 0 : i32
    return %c0_i32, %arg0 : i32, i32
  }
  func.func @transform_1(%arg0: i32) -> (i32, i32) {
    %c0_i32 = arith.constant 0 : i32
    %c0_i32_0 = arith.constant 0 : i32
    %c0_i32_1 = arith.constant 0 : i32
    return %c0_i32, %c0_i32_0 : i32, i32
  }
  func.func @transform_2(%arg0: i32) -> (i32, i32, i32) {
    %c0_i32 = arith.constant 0 : i32
    %c0_i32_0 = arith.constant 0 : i32
    %c0_i32_1 = arith.constant 0 : i32
    return %arg0, %c0_i32, %c0_i32_0 : i32, i32, i32
  }
  func.func @transform_3(%arg0: i32) -> (i32, i32, i32) {
    %c0_i32 = arith.constant 0 : i32
    %c0_i32_0 = arith.constant 0 : i32
    %c0_i32_1 = arith.constant 0 : i32
    return %arg0, %c0_i32, %c0_i32_0 : i32, i32, i32
  }
}

module attributes {stable_mosaic.version = 11 : i64} {
  func.func @_conv_bn_relu_kernel(%arg0: i32, %arg1: memref<36x128xbf16, #tpu.memory_space<vmem>>, %arg2: memref<8x36xbf16, #tpu.memory_space<vmem>>, %arg3: memref<8x1xf32, #tpu.memory_space<vmem>>, %arg4: memref<8x1xf32, #tpu.memory_space<vmem>>, %arg5: memref<8x128xf32, #tpu.memory_space<vmem>>) attributes {dimension_semantics = [#tpu.dimension_semantics<parallel>], iteration_bounds = array<i64: 4>, scalar_prefetch = 0 : i64, scratch_operands = 0 : i64, tpu.core_type = #tpu.core_type<tc>, window_params = [{transform_indices = @transform_0, window_bounds = array<i64: 36, 128>}, {pipeline_mode = #tpu.pipeline_mode<synchronous>, transform_indices = @transform_1, window_bounds = array<i64: 8, 36>}, {pipeline_mode = #tpu.pipeline_mode<synchronous>, transform_indices = @transform_2, window_bounds = array<i64: 8, 1>}, {pipeline_mode = #tpu.pipeline_mode<synchronous>, transform_indices = @transform_3, window_bounds = array<i64: 8, 1>}, {transform_indices = @transform_4, window_bounds = array<i64: 8, 128>}]} {
    %c0 = arith.constant 0 : index
    %c0_0 = arith.constant 0 : index
    %0 = vector.load %arg2[%c0, %c0_0] : memref<8x36xbf16, #tpu.memory_space<vmem>>, vector<8x36xbf16>
    %c0_1 = arith.constant 0 : index
    %c0_2 = arith.constant 0 : index
    %1 = vector.load %arg1[%c0_1, %c0_2] : memref<36x128xbf16, #tpu.memory_space<vmem>>, vector<36x128xbf16>
    %cst = arith.constant dense<0.000000e+00> : vector<8x128xf32>
    %2 = tpu.matmul %0, %1, %cst {dimension_numbers = #tpu.dot_dimension_numbers<[1], [0], [0], [1], [0, 0, 1, 1], [], []>} : vector<8x36xbf16>, vector<36x128xbf16>, vector<8x128xf32> -> vector<8x128xf32>
    %c0_3 = arith.constant 0 : index
    %c0_4 = arith.constant 0 : index
    %3 = vector.load %arg3[%c0_3, %c0_4] : memref<8x1xf32, #tpu.memory_space<vmem>>, vector<8x1xf32>
    %4 = vector.broadcast %3 : vector<8x1xf32> to vector<8x128xf32>
    %5 = arith.mulf %2, %4 : vector<8x128xf32>
    %c0_5 = arith.constant 0 : index
    %c0_6 = arith.constant 0 : index
    %6 = vector.load %arg4[%c0_5, %c0_6] : memref<8x1xf32, #tpu.memory_space<vmem>>, vector<8x1xf32>
    %7 = vector.broadcast %6 : vector<8x1xf32> to vector<8x128xf32>
    %8 = arith.addf %5, %7 : vector<8x128xf32>
    %cst_7 = arith.constant 0.000000e+00 : f32
    %9 = vector.broadcast %cst_7 : f32 to vector<8x128xf32>
    %10 = arith.maximumf %8, %9 : vector<8x128xf32>
    %c0_8 = arith.constant 0 : index
    %c0_9 = arith.constant 0 : index
    %11 = vector.load %arg5[%c0_8, %c0_9] : memref<8x128xf32, #tpu.memory_space<vmem>>, vector<8x128xf32>
    tpu.vector_store %arg5[%c0_8, %c0_9], %10 {strides = array<i32>} : memref<8x128xf32, #tpu.memory_space<vmem>>, vector<8x128xf32>,
    return
  }
  func.func @transform_0(%arg0: i32) -> (i32, i32) {
    %c0_i32 = arith.constant 0 : i32
    %c0_i32_0 = arith.constant 0 : i32
    return %c0_i32, %arg0 : i32, i32
  }
  func.func @transform_1(%arg0: i32) -> (i32, i32) {
    %c0_i32 = arith.constant 0 : i32
    %c0_i32_0 = arith.constant 0 : i32
    %c0_i32_1 = arith.constant 0 : i32
    return %c0_i32, %c0_i32_0 : i32, i32
  }
  func.func @transform_2(%arg0: i32) -> (i32, i32) {
    %c0_i32 = arith.constant 0 : i32
    %c0_i32_0 = arith.constant 0 : i32
    %c0_i32_1 = arith.constant 0 : i32
    return %c0_i32, %c0_i32_0 : i32, i32
  }
  func.func @transform_3(%arg0: i32) -> (i32, i32) {
    %c0_i32 = arith.constant 0 : i32
    %c0_i32_0 = arith.constant 0 : i32
    %c0_i32_1 = arith.constant 0 : i32
    return %c0_i32, %c0_i32_0 : i32, i32
  }
  func.func @transform_4(%arg0: i32) -> (i32, i32) {
    %c0_i32 = arith.constant 0 : i32
    %c0_i32_0 = arith.constant 0 : i32
    return %c0_i32, %arg0 : i32, i32
  }
}

</mosaic_0001>

<bundles_post_ra>
// kernel: conv2d_block_forward.2
= control target key start
LH: loop header
LB: loop body
LE: loop exit
PB: predicated region body
PF: predicated region fallthrough
CT: control target
= control target key end

     0   :  { %s528_s12 = smov 0   ;;  %s530_s13 = smov 0   ;;  %s597_s0 = inlined_call_operand.vmem [shape: bf16[36,512], index: 0, kind: input, shape index: {}]   ;;  %s598_s1 = inlined_call_operand.vmem [shape: bf16[8,36], index: 1, kind: input, shape index: {}]   ;;  %s599_s2 = inlined_call_operand.vmem [shape: f32[4,8,1], index: 2, kind: output, shape index: {0}]   ;;  %s600_s3 = inlined_call_operand.vmem [shape: f32[4,8,1], index: 3, kind: output, shape index: {1}]  }
   0x1   :  { %s532_s14 = smov 0  }
   0x2 LB: > { %s544_s15 = sadd.s32 4294967295, %s504_s14   ;;  %s547_s16 = sadd.s32 1, %s504_s14   ;;  %s504_s14 = sphi %s532_s14, %s605_s14   ;;  %s500_s13 = sphi %s530_s13, %s604_s13   ;;  %s496_s12 = sphi %s528_s12, %s603_s12  }
   0x3   : > { %s18_s17 = ssub.s32 %s504_s14, %s547_s16  ;;  %s21_s18 = sadd.s32 1, %s500_s13 }
   0x4   : > { %p19_p0 = scmp.eq.s32.totalorder %s18_s17, 0  ;;  %p28_p1 = scmp.ne.s32.totalorder %s500_s13, %s496_s12 }
   0x5   : > { %p29_p2 = scmp.eq.s32.totalorder %s504_s14, 0  ;;  %p423_p4 = scmp.ge.s32.totalorder %s504_s14, 4 }
   0x6   : > { %s556_s19 = scalar_select %p19_p0, %s500_s13, %s21_s18  }
   0x7   : > { %p30_p3 = por %p29_p2, %p28_p1  ;;  %130 = sbr.rel (%p423_p4) target bundleno = 21 (0x15), region = 20 }
   0xe   : > { %133 = sbr.rel (!%p30_p3) target bundleno = 21 (0x15), region = 24  ;;  %s135_s20 = sand.u32 (%p30_p3), 1, %s500_s13  }
   0xf   : > { %s424_s21 = sshll.u32 (%p30_p3), %s504_s14, 2  ;;  %s449_s22 = smul.u32 (%p30_p3), 20, %s135_s20 }
  0x10   : > { %s139_s25 = scalar_lea.vmem (%p30_p3), %s597_s0, %s424_s21 }
  0x11   : > { %v155_v0 = vld [vmem:[%s139_s25] sm:$0xf] (%p30_p3)  ;;  %v157_v1 = vld [vmem:[%s139_s25 + $0x10] sm:$0xf] (%p30_p3)  ;;  %s137_s26 = scalar_lea.vmem (%p30_p3), [#allocation2], %s449_s22 }
  0x12   : > { %v159_v2 = vld [vmem:[%s139_s25 + $0x20] sm:$0xf] (%p30_p3)  ;;  %v161_v3 = vld [vmem:[%s139_s25 + $0x30] sm:$0xf] (%p30_p3)  ;;  %156 = vst [vmem:[%s137_s26] sm:$0xf] (%p30_p3), %v155_v0 }
  0x13   : > { %v163_v4 = vld [vmem:[%s139_s25 + $0x40] sm:$0xf] (%p30_p3)  ;;  %158 = vst [vmem:[%s137_s26 + $0x4] sm:$0xf] (%p30_p3), %v157_v1  ;;  %160 = vst [vmem:[%s137_s26 + $0x8] sm:$0xf] (%p30_p3), %v159_v2 }
  0x14   : > { %162 = vst [vmem:[%s137_s26 + $0xc] sm:$0xf] (%p30_p3), %v161_v3  ;;  %164 = vst [vmem:[%s137_s26 + $0x10] sm:$0xf] (%p30_p3), %v163_v4 }
  0x15 PF: > { %p425_p5 = scmp.ge.s32.totalorder %s504_s14, 1  ;;  %p196_p6 = scmp.lt.s32.totalorder %s504_s14, 5 }
  0x17   : > { %p197_p7 = pnand %p425_p5, %p196_p6 }
  0x18   : > { %s203_s27 = sand.u32 (!%p197_p7), 1, %s496_s12   ;;  %v506_v5 = vmov (!%p197_p7), 0.0   ;;  %vm507_vm0 = vmmov (!%p197_p7), 0   ;;  %vm263_vm1 = vcmask (!%p197_p7), 1041408   ;;  %v238_v10 = vld [vmem:[%s598_s1] sm:$0xf] (!%p197_p7)  ;;  %v309_v11 = vlaneseq (!%p197_p7) }
  0x19   : > { %200 = sbr.rel (%p197_p7) target bundleno = 546 (0x222), region = 65  ;;  %439 = vmatprep.subr.bf16.mxu0 (!%p197_p7), %v506_v5  ;;  %445 = vmatprep.mubr.msk.bf16.mxu0 (!%p197_p7), %vm507_vm0, %v506_v5  ;;  %vm259_vm2 = vcmask (!%p197_p7), 293888   ;;  %s432_s5 = sshll.u32 (!%p197_p7), %s544_s15, 7  ;;  %vm327_vm4 = vcmask (!%p197_p7), 7168  }
  0x1a   : > { %s450_s28 = smul.u32 (!%p197_p7), 20, %s203_s27  ;;  %s308_s6 = ssub.s32 (!%p197_p7), 512, %s432_s5  ;;  %v310_v12 = vand.u32 (!%p197_p7), 127, %v309_v11 }
  0x1b   : > { %v311_v13 = vstv (!%p197_p7), %s308_s6  ;;  %p313_p8 = scmp.lt.s32.totalorder (!%p197_p7), %s308_s6, 128  ;;  %p229_p9 = scmp.lt.s32.totalorder (!%p197_p7), %s544_s15, 3 }
  0x1c   : > { %s205_s29 = scalar_lea.vmem (!%p197_p7), [#allocation2], %s450_s28  ;;  %vm571_vm3 = vcmp.lt.s32.totalorder (!%p197_p7), %v310_v12, %v311_v13 }
  0x1d   : > { %v477_v6 = vld [vmem:[%s205_s29] sm:$0xff] (!%p197_p7)   ;;  %v478_v7 = vld [vmem:[%s205_s29 + $0x8] sm:$0xff] (!%p197_p7)   ;;  %v479_v8 = vld [vmem:[%s205_s29 + $0x10] ss:$0 sps:$4 sm:$0x33] (!%p197_p7)  }
  0x1e   : > { %440 = vmatpush3.bf16.msra.mxu0 (!%p197_p7), %v477_v6  ;;  %v265_v9 = vsel (!%p197_p7), %vm263_vm1, %v479_v8, 0 }
  0x1f   : > { %441 = vmatprep.subr.bf16.mxu0 (!%p197_p7), %v506_v5 }
  0x20   : > { %s607_s6 = smov (!%p313_p8, %s308_s6), 128  ;;  %s609_s15 = smov (!%p229_p9, %s544_s15), 3 }
  0x21   : > { %s315_s7 = scvt.s32.f32 %s607_s6  ;;  %s426_s8 = sshll.u32 %s609_s15, 3 }
  0x22   : > { %442 = vmatpush3.bf16.msra.mxu0 %v478_v7  ;;  %s232_s11 = scalar_lea.vmem %s599_s2, %s426_s8  ;;  %s236_s17 = scalar_lea.vmem %s600_s3, %s426_s8 }
  0x23   : > { %443 = vmatprep.subr.bf16.mxu0 %v506_v5  ;;  %v319_v20 = vstv %s315_s7 }
  0x24   : > { %480 = vrcp.f32 %v319_v20 }
  0x26   : > { %444 = vmatpush3.bf16.msra.mxu0 %v265_v9 }
  0x29   : > { %446 = vmatmul.mubr.msk.bf16.vlgmr.msra.gmra.mrb[0].mxu0 %vm259_vm2, %v238_v10 }
  0x2e   : > { %v481_v21 = vpop.eup %480 }
  0xfc   : > { %v301_v15 = vpop.f32.mrb[0].mxu0 }
  0xfd   : > { %v447_v16 = vpop.f32.mrb[1].mxu0  ;;  %v316_v17 = vsel %vm571_vm3, %v301_v15, 0.0 }
  0xfe   : > { %317 = vadd.xlane.f32.xlu0 %v316_v17  ;;  %v304_v18 = vpop.f32.mrb[2].mxu0 }
  0xff   : > { %v448_v19 = vpop.f32.mrb[3].mxu0 }
 0x18b   : > { %v318_v22 = vpop.xlane.xlu0 %317 }
 0x18c   : > { %v321_v23 = vmul.f32 %v481_v21, %v318_v22 }
 0x18e   : > { %v322_v24 = vsub.f32 %v301_v15, %v321_v23  ;;  %328 = vst.msk [vmem:[%s232_s11] sm:$0xff] %vm327_vm4, %v321_v23 }
 0x190   : > { %v323_v25 = vsel %vm571_vm3, %v322_v24, 0.0 }
 0x191   : > { %v324_v26 = vmul.f32 %v323_v25, %v323_v25 }
 0x193   : > { %325 = vadd.xlane.f32.xlu0 %v324_v26 }
 0x220   : > { %v326_v27 = vpop.xlane.xlu0 %325 }
 0x221   : > { %329 = vst.msk [vmem:[%s236_s17] sm:$0xff] %vm327_vm4, %v326_v27 }
 0x222 PF: > { %p11_p10 = scmp.ge.s32.totalorder %s547_s16, 6   ;;  %s603_s12 = smov %s500_s13 }
 0x223   : > { %s604_s13 = smov %s556_s19  ;;  %s605_s14 = smov %s547_s16 }
 0x224   :  { %13 = sbr.rel (!%p11_p10) target bundleno = 2 (0x2), region = 116 }

// kernel: conv2d_block_forward.3
= control target key start
LH: loop header
LB: loop body
LE: loop exit
PB: predicated region body
PF: predicated region fallthrough
CT: control target
= control target key end

     0   :  { %s510_s15 = smov 0   ;;  %s512_s16 = smov 0   ;;  %s573_s0 = inlined_call_operand.vmem [shape: bf16[36,512], index: 0, kind: input, shape index: {}]   ;;  %s574_s1 = inlined_call_operand.vmem [shape: bf16[8,36], index: 1, kind: input, shape index: {}]   ;;  %s575_s2 = inlined_call_operand.vmem [shape: f32[8,1], index: 2, kind: input, shape index: {}]   ;;  %s576_s3 = inlined_call_operand.vmem [shape: f32[8,1], index: 3, kind: input, shape index: {}]   ;;  %s577_s4 = inlined_call_operand.vmem [shape: f32[8,512], index: 4, kind: output, shape index: {}]  }
   0x1   :  { %s514_s17 = smov 0  }
   0x2 LB: > { %s398_s18 = sadd.s32 4294967295, %s480_s17   ;;  %s527_s19 = sadd.s32 1, %s480_s17   ;;  %s480_s17 = sphi %s514_s17, %s580_s17   ;;  %s476_s16 = sphi %s512_s16, %s579_s16   ;;  %s472_s15 = sphi %s510_s15, %s578_s15  }
   0x3   : > { %s18_s20 = ssub.s32 %s480_s17, %s527_s19  ;;  %s21_s21 = sadd.s32 1, %s476_s16 }
   0x4   : > { %p19_p0 = scmp.eq.s32.totalorder %s18_s20, 0  ;;  %p28_p1 = scmp.ne.s32.totalorder %s476_s16, %s472_s15 }
   0x5   : > { %p29_p2 = scmp.eq.s32.totalorder %s480_s17, 0  ;;  %p401_p4 = scmp.ge.s32.totalorder %s480_s17, 4 }
   0x6   : > { %s536_s22 = scalar_select %p19_p0, %s476_s16, %s21_s21  }
   0x7   : > { %p30_p3 = por %p29_p2, %p28_p1  ;;  %152 = sbr.rel (%p401_p4) target bundleno = 21 (0x15), region = 28 }
   0xe   : > { %155 = sbr.rel (!%p30_p3) target bundleno = 21 (0x15), region = 32  ;;  %s157_s23 = sand.u32 (%p30_p3), 1, %s476_s16  }
   0xf   : > { %s402_s24 = sshll.u32 (%p30_p3), %s480_s17, 2  ;;  %s425_s25 = smul.u32 (%p30_p3), 20, %s157_s23 }
  0x10   : > { %s161_s28 = scalar_lea.vmem (%p30_p3), %s573_s0, %s402_s24 }
  0x11   : > { %v177_v0 = vld [vmem:[%s161_s28] sm:$0xf] (%p30_p3)  ;;  %v179_v1 = vld [vmem:[%s161_s28 + $0x10] sm:$0xf] (%p30_p3)  ;;  %s159_s29 = scalar_lea.vmem (%p30_p3), [#allocation2], %s425_s25 }
  0x12   : > { %v181_v2 = vld [vmem:[%s161_s28 + $0x20] sm:$0xf] (%p30_p3)  ;;  %v183_v3 = vld [vmem:[%s161_s28 + $0x30] sm:$0xf] (%p30_p3)  ;;  %178 = vst [vmem:[%s159_s29] sm:$0xf] (%p30_p3), %v177_v0 }
  0x13   : > { %v185_v4 = vld [vmem:[%s161_s28 + $0x40] sm:$0xf] (%p30_p3)  ;;  %180 = vst [vmem:[%s159_s29 + $0x4] sm:$0xf] (%p30_p3), %v179_v1  ;;  %182 = vst [vmem:[%s159_s29 + $0x8] sm:$0xf] (%p30_p3), %v181_v2 }
  0x14   : > { %184 = vst [vmem:[%s159_s29 + $0xc] sm:$0xf] (%p30_p3), %v183_v3  ;;  %186 = vst [vmem:[%s159_s29 + $0x10] sm:$0xf] (%p30_p3), %v185_v4 }
  0x15 PF: > { %p403_p5 = scmp.ge.s32.totalorder %s480_s17, 1  ;;  %p218_p6 = scmp.lt.s32.totalorder %s480_s17, 5 }
  0x17   : > { %p219_p7 = pnand %p403_p5, %p218_p6 }
  0x18   : > { %s225_s30 = sand.u32 (!%p219_p7), 1, %s472_s15   ;;  %v482_v5 = vmov (!%p219_p7), 0.0   ;;  %vm483_vm0 = vmmov (!%p219_p7), 0   ;;  %v323_v6 = vld [vmem:[%s575_s2] sm:$0xff] (!%p219_p7)  ;;  %v484_v7 = vmov (!%p219_p7), 0   ;;  %vm279_vm1 = vcmask (!%p219_p7), 1041408  }
  0x19   : > { %222 = sbr.rel (%p219_p7) target bundleno = 260 (0x104), region = 73  ;;  %415 = vmatprep.subr.bf16.mxu0 (!%p219_p7), %v482_v5  ;;  %421 = vmatprep.mubr.msk.bf16.mxu0 (!%p219_p7), %vm483_vm0, %v482_v5  ;;  %v330_v8 = vld [vmem:[%s576_s3] sm:$0xff] (!%p219_p7)  ;;  %vm275_vm2 = vcmask (!%p219_p7), 293888   ;;  %p249_p8 = scmp.lt.s32.totalorder (!%p219_p7), %s398_s18, 3 }
  0x1a   : > { %s426_s5 = smul.u32 (!%p219_p7), 20, %s225_s30  ;;  %454 = vset.pattern.permute.xlu0 (!%p219_p7), %v484_v7  ;;  %v254_v13 = vld [vmem:[%s574_s1] sm:$0xf] (!%p219_p7) }
  0x1b   : > { %326 = vperm.xlu0 (!%p219_p7), %454, %v323_v6  }
  0x1c   : > { %s227_s10 = scalar_lea.vmem (!%p219_p7), [#allocation2], %s426_s5 }
  0x1d   : > { %v455_v9 = vld [vmem:[%s227_s10] sm:$0xff] (!%p219_p7)   ;;  %v456_v10 = vld [vmem:[%s227_s10 + $0x8] sm:$0xff] (!%p219_p7)   ;;  %v457_v11 = vld [vmem:[%s227_s10 + $0x10] ss:$0 sps:$4 sm:$0x33] (!%p219_p7)  }
  0x1e   : > { %416 = vmatpush3.bf16.msra.mxu0 (!%p219_p7), %v455_v9  ;;  %v281_v12 = vsel (!%p219_p7), %vm279_vm1, %v457_v11, 0 }
  0x1f   : > { %417 = vmatprep.subr.bf16.mxu0 (!%p219_p7), %v482_v5  ;;  %333 = vperm.xlu0 (!%p219_p7), %454, %v330_v8  }
  0x20   : > { %s582_s18 = smov (!%p249_p8, %s398_s18), 3 }
  0x21   : > { %s404_s13 = sshll.u32 %s582_s18, 3 }
  0x22   : > { %418 = vmatpush3.bf16.msra.mxu0 %v456_v10  ;;  %s252_s20 = scalar_lea.vmem %s577_s4, %s404_s13 }
  0x23   : > { %419 = vmatprep.subr.bf16.mxu0 %v482_v5 }
  0x26   : > { %420 = vmatpush3.bf16.msra.mxu0 %v281_v12 }
  0x29   : > { %422 = vmatmul.mubr.msk.bf16.vlgmr.msra.gmra.mrb[0].mxu0 %vm275_vm2, %v254_v13 }
  0x9a   : > { %v327_v14 = vpop.permute.xlu0 %326 }
  0x9e   : > { %v334_v18 = vpop.permute.xlu0 %333 }
  0xfc   : > { %v317_v15 = vpop.f32.mrb[0].mxu0 }
  0xfd   : > { %v329_v16 = vmul.f32 %v327_v14, %v317_v15  ;;  %v423_v17 = vpop.f32.mrb[1].mxu0 }
  0xfe   : > { %v320_v19 = vpop.f32.mrb[2].mxu0 }
  0xff   : > { %v336_v20 = vadd.f32 %v334_v18, %v329_v16  ;;  %v424_v21 = vpop.f32.mrb[3].mxu0 }
 0x101   : > { %v337_v22 = vmax.f32 %v336_v20, 0.0 }
 0x103   : > { %338 = vst [vmem:[%s252_s20] sm:$0xff] %v337_v22 }
 0x104 PF: > { %p11_p9 = scmp.ge.s32.totalorder %s527_s19, 6   ;;  %s578_s15 = smov %s476_s16 }
 0x105   : > { %s579_s16 = smov %s536_s22  ;;  %s580_s17 = smov %s527_s19 }
 0x106   :  { %13 = sbr.rel (!%p11_p9) target bundleno = 2 (0x2), region = 112 }

</bundles_post_ra>
